<compile_context>
chip_gen: v5e
topology: v5e:2x2
jax: 0.10.0
libtpu: 0.0.40
codegen_flags: <defaults>
</compile_context>

<pallas_src>
import jax
import jax.numpy as jnp
from jax.experimental import pallas as pl
from jax.experimental.pallas import tpu as pltpu


def _round_up(x, m):
    return ((x + m - 1) // m) * m


def _cdiv(a, b):
    return -(-a // b)


def autoencoder_kernel(x_ref,
                       w1t_ref, b1_ref,   # encoder layer 1: (in, hidden),    (1, hidden)
                       w2t_ref, b2_ref,   # encoder layer 2: (hidden, latent),(1, latent)
                       w3t_ref, b3_ref,   # decoder layer 1: (latent, hidden),(1, hidden)
                       w4t_ref, b4_ref,   # decoder layer 2: (hidden, in),    (1, in) — no ReLU
                       o_ref):
    x = x_ref[...]                                              # (TILE_N, F) row-major

    # ---- encode ----  (f32 accumulation on the MXU, ReLU on the VPU)
    h = jnp.dot(x, w1t_ref[...], preferred_element_type=jnp.float32) + b1_ref[...]
    h = jnp.maximum(h, 0.0)
    z = jnp.dot(h, w2t_ref[...], preferred_element_type=jnp.float32) + b2_ref[...]
    z = jnp.maximum(z, 0.0)

    # ---- decode ----
    d = jnp.dot(z, w3t_ref[...], preferred_element_type=jnp.float32) + b3_ref[...]
    d = jnp.maximum(d, 0.0)
    y = jnp.dot(d, w4t_ref[...], preferred_element_type=jnp.float32) + b4_ref[...]

    o_ref[...] = y.astype(o_ref.dtype)                          # contiguous row-major store


def autoencoder_forward(x, params, max_tile=None):
    """x: (N, F) row-major.  params: PyTorch layout — W (out, in), b (out,)."""
    n, f = x.shape

    if max_tile is None:
        # ~1 MiB of activations per tile per stream; big enough to amortize the
        # ~0.35 us per-step overhead, small enough for every generation's VMEM.
        max_tile = 16384 if x.dtype == jnp.bfloat16 else 8192

    # Batch-balanced tile sizing: padding slack stays < 8 rows, and large
    # batches get >= 2 tiles so v7x's two TensorCores both have work.
    min_tiles = 2 if n >= 2 * 4096 else 1
    num_tiles = max(_cdiv(n, max_tile), min_tiles)
    tile_n = _round_up(_cdiv(n, num_tiles), 8)
    grid_n = _cdiv(n, tile_n)

    # Tiny one-time prep (~2 KB): transposed weights + row-vector biases so the
    # kernel multiplies row-major tiles directly (no activation transposes).
    w1t = params["w1"].T; b1 = params["b1"].reshape(1, -1)
    w2t = params["w2"].T; b2 = params["b2"].reshape(1, -1)
    w3t = params["w3"].T; b3 = params["b3"].reshape(1, -1)
    w4t = params["w4"].T; b4 = params["b4"].reshape(1, -1)

    operands = (x, w1t, b1, w2t, b2, w3t, b3, w4t, b4)

    # Weights/biases: full-extent blocks with a constant index_map -> fetched
    # once, resident in VMEM across all grid steps.  x / out stream per tile.
    resident = lambda a: pl.BlockSpec(a.shape, lambda i: (0, 0))

    out = pl.pallas_call(
        autoencoder_kernel,
        out_shape=jax.ShapeDtypeStruct((n, f), x.dtype),
        grid=(grid_n,),
        in_specs=[pl.BlockSpec((tile_n, f), lambda i: (i, 0))]
                + [resident(a) for a in operands[1:]],
        out_specs=pl.BlockSpec((tile_n, f), lambda i: (i, 0)),
        compiler_params=pltpu.CompilerParams(
            dimension_semantics=("parallel",)),   # batch tiles independent -> megacore/2-TC
    )(*operands)

    return out


def init_params(key, in_dim=32, hidden=16, latent=8, dtype=jnp.float32):
    """Synthetic parameters matching PyTorch nn.Linear layout: W (out, in), b (out,)."""
    ks = jax.random.split(key, 8)

    def lin(kw, kb, fan_in, fan_out):
        bound = fan_in ** -0.5
        w = jax.random.uniform(kw, (fan_out, fan_in), jnp.float32, -bound, bound)
        b = jax.random.uniform(kb, (fan_out,), jnp.float32, -bound, bound)
        return w.astype(dtype), b.astype(dtype)

    w1, b1 = lin(ks[0], ks[1], in_dim, hidden)
    w2, b2 = lin(ks[2], ks[3], hidden, latent)
    w3, b3 = lin(ks[4], ks[5], latent, hidden)
    w4, b4 = lin(ks[6], ks[7], hidden, in_dim)
    return {"w1": w1, "b1": b1, "w2": w2, "b2": b2,
            "w3": w3, "b3": b3, "w4": w4, "b4": b4}


def reference_forward(x, p):
    """Plain-JAX (f32) reference mirroring the PyTorch layer stack."""
    f32 = lambda a: a.astype(jnp.float32)
    h = jnp.maximum(f32(x) @ f32(p["w1"]).T + f32(p["b1"]), 0.0)
    z = jnp.maximum(h @ f32(p["w2"]).T + f32(p["b2"]), 0.0)
    d = jnp.maximum(z @ f32(p["w3"]).T + f32(p["b3"]), 0.0)
    return d @ f32(p["w4"]).T + f32(p["b4"])


# TODO(synk): AutoEncoderModel is a generic nn.ModuleList container; only the
# canonical dense Linear+ReLU encoder/decoder stack is fused here — arbitrary
# user-supplied layer lists (conv, dropout, ...) are not translated generically.

if __name__ == "__main__":
    key = jax.random.PRNGKey(0)
    k_x, k_p = jax.random.split(key)
    in_dim, hidden, latent = 32, 16, 8

    # 1) small f32 demo batch: tight tolerance vs the plain-JAX reference.
    x_small = jax.random.normal(k_x, (8, in_dim), dtype=jnp.float32)
    p_f32 = init_params(k_p, in_dim, hidden, latent, dtype=jnp.float32)
    out_small = jax.block_until_ready(autoencoder_forward(x_small, p_f32))
    ref_small = reference_forward(x_small, p_f32)
    assert out_small.shape == x_small.shape
    assert jnp.allclose(out_small, ref_small, atol=1e-5, rtol=1e-5), "f32 mismatch"

    # 2) larger batch in bf16: exercises the reduced-HBM-byte path (bf16 I/O,
    #    f32 accumulation inside the kernel) with a single balanced tile.
    x_big = jax.random.normal(k_x, (1000, in_dim), dtype=jnp.float32)
    p_bf16 = jax.tree_util.tree_map(lambda a: a.astype(jnp.bfloat16), p_f32)
    out_big = jax.block_until_ready(
        autoencoder_forward(x_big.astype(jnp.bfloat16), p_bf16))
    ref_big = reference_forward(x_big.astype(jnp.bfloat16), p_bf16)
    assert out_big.shape == x_big.shape
    assert jnp.allclose(out_big.astype(jnp.float32), ref_big, atol=5e-2, rtol=5e-2), \
        "bf16 mismatch"

    print("KERNEL_OK")
</pallas_src>

<mosaic_0001>
module attributes {stable_mosaic.version = 11 : i64} {
  func.func @autoencoder_kernel(%arg0: i32, %arg1: memref<8x32xf32, #tpu.memory_space<vmem>>, %arg2: memref<32x16xf32, #tpu.memory_space<vmem>>, %arg3: memref<1x16xf32, #tpu.memory_space<vmem>>, %arg4: memref<16x8xf32, #tpu.memory_space<vmem>>, %arg5: memref<1x8xf32, #tpu.memory_space<vmem>>, %arg6: memref<8x16xf32, #tpu.memory_space<vmem>>, %arg7: memref<1x16xf32, #tpu.memory_space<vmem>>, %arg8: memref<16x32xf32, #tpu.memory_space<vmem>>, %arg9: memref<1x32xf32, #tpu.memory_space<vmem>>, %arg10: memref<8x32xf32, #tpu.memory_space<vmem>>) attributes {dimension_semantics = [#tpu.dimension_semantics<parallel>], iteration_bounds = array<i64: 1>, scalar_prefetch = 0 : i64, scratch_operands = 0 : i64, tpu.core_type = #tpu.core_type<tc>, window_params = [{transform_indices = @transform_0, window_bounds = array<i64: 8, 32>}, {pipeline_mode = #tpu.pipeline_mode<synchronous>, transform_indices = @transform_1, window_bounds = array<i64: 32, 16>}, {pipeline_mode = #tpu.pipeline_mode<synchronous>, transform_indices = @transform_2, window_bounds = array<i64: 1, 16>}, {pipeline_mode = #tpu.pipeline_mode<synchronous>, transform_indices = @transform_3, window_bounds = array<i64: 16, 8>}, {pipeline_mode = #tpu.pipeline_mode<synchronous>, transform_indices = @transform_4, window_bounds = array<i64: 1, 8>}, {pipeline_mode = #tpu.pipeline_mode<synchronous>, transform_indices = @transform_5, window_bounds = array<i64: 8, 16>}, {pipeline_mode = #tpu.pipeline_mode<synchronous>, transform_indices = @transform_6, window_bounds = array<i64: 1, 16>}, {pipeline_mode = #tpu.pipeline_mode<synchronous>, transform_indices = @transform_7, window_bounds = array<i64: 16, 32>}, {pipeline_mode = #tpu.pipeline_mode<synchronous>, transform_indices = @transform_8, window_bounds = array<i64: 1, 32>}, {transform_indices = @transform_9, window_bounds = array<i64: 8, 32>}]} {
    %c0 = arith.constant 0 : index
    %c0_0 = arith.constant 0 : index
    %0 = vector.load %arg1[%c0, %c0_0] : memref<8x32xf32, #tpu.memory_space<vmem>>, vector<8x32xf32>
    %c0_1 = arith.constant 0 : index
    %c0_2 = arith.constant 0 : index
    %1 = vector.load %arg2[%c0_1, %c0_2] : memref<32x16xf32, #tpu.memory_space<vmem>>, vector<32x16xf32>
    %cst = arith.constant dense<0.000000e+00> : vector<8x16xf32>
    %2 = tpu.matmul %0, %1, %cst {dimension_numbers = #tpu.dot_dimension_numbers<[1], [0], [0], [1], [0, 0, 1, 1], [], []>} : vector<8x32xf32>, vector<32x16xf32>, vector<8x16xf32> -> vector<8x16xf32>
    %c0_3 = arith.constant 0 : index
    %c0_4 = arith.constant 0 : index
    %3 = vector.load %arg3[%c0_3, %c0_4] : memref<1x16xf32, #tpu.memory_space<vmem>>, vector<1x16xf32>
    %4 = vector.broadcast %3 : vector<1x16xf32> to vector<8x16xf32>
    %5 = arith.addf %2, %4 : vector<8x16xf32>
    %cst_5 = arith.constant 0.000000e+00 : f32
    %6 = vector.broadcast %cst_5 : f32 to vector<8x16xf32>
    %7 = arith.maximumf %5, %6 : vector<8x16xf32>
    %c0_6 = arith.constant 0 : index
    %c0_7 = arith.constant 0 : index
    %8 = vector.load %arg4[%c0_6, %c0_7] : memref<16x8xf32, #tpu.memory_space<vmem>>, vector<16x8xf32>
    %cst_8 = arith.constant dense<0.000000e+00> : vector<8x8xf32>
    %9 = tpu.matmul %7, %8, %cst_8 {dimension_numbers = #tpu.dot_dimension_numbers<[1], [0], [0], [1], [0, 0, 1, 1], [], []>} : vector<8x16xf32>, vector<16x8xf32>, vector<8x8xf32> -> vector<8x8xf32>
    %c0_9 = arith.constant 0 : index
    %c0_10 = arith.constant 0 : index
    %10 = vector.load %arg5[%c0_9, %c0_10] : memref<1x8xf32, #tpu.memory_space<vmem>>, vector<1x8xf32>
    %11 = vector.broadcast %10 : vector<1x8xf32> to vector<8x8xf32>
    %12 = arith.addf %9, %11 : vector<8x8xf32>
    %cst_11 = arith.constant 0.000000e+00 : f32
    %13 = vector.broadcast %cst_11 : f32 to vector<8x8xf32>
    %14 = arith.maximumf %12, %13 : vector<8x8xf32>
    %c0_12 = arith.constant 0 : index
    %c0_13 = arith.constant 0 : index
    %15 = vector.load %arg6[%c0_12, %c0_13] : memref<8x16xf32, #tpu.memory_space<vmem>>, vector<8x16xf32>
    %cst_14 = arith.constant dense<0.000000e+00> : vector<8x16xf32>
    %16 = tpu.matmul %14, %15, %cst_14 {dimension_numbers = #tpu.dot_dimension_numbers<[1], [0], [0], [1], [0, 0, 1, 1], [], []>} : vector<8x8xf32>, vector<8x16xf32>, vector<8x16xf32> -> vector<8x16xf32>
    %c0_15 = arith.constant 0 : index
    %c0_16 = arith.constant 0 : index
    %17 = vector.load %arg7[%c0_15, %c0_16] : memref<1x16xf32, #tpu.memory_space<vmem>>, vector<1x16xf32>
    %18 = vector.broadcast %17 : vector<1x16xf32> to vector<8x16xf32>
    %19 = arith.addf %16, %18 : vector<8x16xf32>
    %cst_17 = arith.constant 0.000000e+00 : f32
    %20 = vector.broadcast %cst_17 : f32 to vector<8x16xf32>
    %21 = arith.maximumf %19, %20 : vector<8x16xf32>
    %c0_18 = arith.constant 0 : index
    %c0_19 = arith.constant 0 : index
    %22 = vector.load %arg8[%c0_18, %c0_19] : memref<16x32xf32, #tpu.memory_space<vmem>>, vector<16x32xf32>
    %cst_20 = arith.constant dense<0.000000e+00> : vector<8x32xf32>
    %23 = tpu.matmul %21, %22, %cst_20 {dimension_numbers = #tpu.dot_dimension_numbers<[1], [0], [0], [1], [0, 0, 1, 1], [], []>} : vector<8x16xf32>, vector<16x32xf32>, vector<8x32xf32> -> vector<8x32xf32>
    %c0_21 = arith.constant 0 : index
    %c0_22 = arith.constant 0 : index
    %24 = vector.load %arg9[%c0_21, %c0_22] : memref<1x32xf32, #tpu.memory_space<vmem>>, vector<1x32xf32>
    %25 = vector.broadcast %24 : vector<1x32xf32> to vector<8x32xf32>
    %26 = arith.addf %23, %25 : vector<8x32xf32>
    %c0_23 = arith.constant 0 : index
    %c0_24 = arith.constant 0 : index
    %27 = vector.load %arg10[%c0_23, %c0_24] : memref<8x32xf32, #tpu.memory_space<vmem>>, vector<8x32xf32>
    tpu.vector_store %arg10[%c0_23, %c0_24], %26 {strides = array<i32>} : memref<8x32xf32, #tpu.memory_space<vmem>>, vector<8x32xf32>,
    return
  }
  func.func @transform_0(%arg0: i32) -> (i32, i32) {
    %c0_i32 = arith.constant 0 : i32
    %c0_i32_0 = arith.constant 0 : i32
    return %arg0, %c0_i32 : i32, i32
  }
  func.func @transform_1(%arg0: i32) -> (i32, i32) {
    %c0_i32 = arith.constant 0 : i32
    %c0_i32_0 = arith.constant 0 : i32
    %c0_i32_1 = arith.constant 0 : i32
    return %c0_i32, %c0_i32_0 : i32, i32
  }
  func.func @transform_2(%arg0: i32) -> (i32, i32) {
    %c0_i32 = arith.constant 0 : i32
    %c0_i32_0 = arith.constant 0 : i32
    %c0_i32_1 = arith.constant 0 : i32
    return %c0_i32, %c0_i32_0 : i32, i32
  }
  func.func @transform_3(%arg0: i32) -> (i32, i32) {
    %c0_i32 = arith.constant 0 : i32
    %c0_i32_0 = arith.constant 0 : i32
    %c0_i32_1 = arith.constant 0 : i32
    return %c0_i32, %c0_i32_0 : i32, i32
  }
  func.func @transform_4(%arg0: i32) -> (i32, i32) {
    %c0_i32 = arith.constant 0 : i32
    %c0_i32_0 = arith.constant 0 : i32
    %c0_i32_1 = arith.constant 0 : i32
    return %c0_i32, %c0_i32_0 : i32, i32
  }
  func.func @transform_5(%arg0: i32) -> (i32, i32) {
    %c0_i32 = arith.constant 0 : i32
    %c0_i32_0 = arith.constant 0 : i32
    %c0_i32_1 = arith.constant 0 : i32
    return %c0_i32, %c0_i32_0 : i32, i32
  }
  func.func @transform_6(%arg0: i32) -> (i32, i32) {
    %c0_i32 = arith.constant 0 : i32
    %c0_i32_0 = arith.constant 0 : i32
    %c0_i32_1 = arith.constant 0 : i32
    return %c0_i32, %c0_i32_0 : i32, i32
  }
  func.func @transform_7(%arg0: i32) -> (i32, i32) {
    %c0_i32 = arith.constant 0 : i32
    %c0_i32_0 = arith.constant 0 : i32
    %c0_i32_1 = arith.constant 0 : i32
    return %c0_i32, %c0_i32_0 : i32, i32
  }
  func.func @transform_8(%arg0: i32) -> (i32, i32) {
    %c0_i32 = arith.constant 0 : i32
    %c0_i32_0 = arith.constant 0 : i32
    %c0_i32_1 = arith.constant 0 : i32
    return %c0_i32, %c0_i32_0 : i32, i32
  }
  func.func @transform_9(%arg0: i32) -> (i32, i32) {
    %c0_i32 = arith.constant 0 : i32
    %c0_i32_0 = arith.constant 0 : i32
    return %arg0, %c0_i32 : i32, i32
  }
}

</mosaic_0001>

<bundles_post_ra>
// kernel: tpu_custom_call.1
= control target key start
LH: loop header
LB: loop body
LE: loop exit
PB: predicated region body
PF: predicated region fallthrough
CT: control target
= control target key end

     0   :  { %s309_s0 = inlined_call_operand.vmem [shape: f32[8,32], index: 0, kind: input, shape index: {}]   ;;  %s310_s1 = inlined_call_operand.vmem [shape: f32[32,16], index: 1, kind: input, shape index: {}]   ;;  %s311_s2 = inlined_call_operand.vmem [shape: f32[1,16], index: 2, kind: input, shape index: {}]   ;;  %s312_s3 = inlined_call_operand.vmem [shape: f32[16,8], index: 3, kind: input, shape index: {}]   ;;  %s313_s4 = inlined_call_operand.vmem [shape: f32[1,8], index: 4, kind: input, shape index: {}]   ;;  %s314_s5 = inlined_call_operand.vmem [shape: f32[8,16], index: 5, kind: input, shape index: {}]   ;;  %s315_s6 = inlined_call_operand.vmem [shape: f32[1,16], index: 6, kind: input, shape index: {}]   ;;  %s316_s7 = inlined_call_operand.vmem [shape: f32[16,32], index: 7, kind: input, shape index: {}]   ;;  %s317_s8 = inlined_call_operand.vmem [shape: f32[1,32], index: 8, kind: input, shape index: {}]   ;;  %s318_s9 = inlined_call_operand.hbm [shape: f32[8,32], index: 9, kind: output, shape index: {}]  }
   0x1   :  { %v37_v0 = vld [vmem:[%s310_s1 + $0x18] sm:$0xff]  ;;  %v36_v1 = vld [vmem:[%s310_s1 + $0x10] sm:$0xff]  ;;  %v35_v2 = vld [vmem:[%s310_s1 + $0x8] sm:$0xff] }
   0x2   :  { %58 = vmatpush.msra.mxu0 %v37_v0 }
   0x4   :  { %59 = vmatpush.msra.mxu0 %v36_v1 }
   0x5   :  { %14 = vsyncpa [#allocation3], 0  ;;  %v34_v3 = vld [vmem:[%s310_s1] sm:$0xff]  ;;  %vm42_vm0 = vcmask 261120   ;;  %v68_v5 = vld [vmem:[%s312_s3 + $0x8] sm:$0xff]  ;;  %vm73_vm1 = vcmask 130048  }
   0x6   :  { %60 = vmatpush.msra.mxu0 %v35_v2  ;;  %v33_v4 = vld [vmem:[%s309_s0] sm:$0xff]  ;;  %91 = vmatpush.msra.mxu1 %v68_v5  ;;  %vm103_vm2 = vcmask 64512   ;;  %v129_v16 = vld [vmem:[%s316_s7 + $0x8] sm:$0xff]  ;;  %s209_s10 = smov [#allocation2]  }
   0x7   :  { %v67_v6 = vld [vmem:[%s312_s3] sm:$0xff]  ;;  %151 = vmatpush.msra.mxu3 %v129_v16  ;;  %s163_s11 = sshll.u32 %s209_s10, 4  ;;  %s164_s11 = int_to_ptr.vmem [resolvable:$true] %s163_s11 }
   0x8   :  { %61 = vmatpush.msra.mxu0 %v34_v3  ;;  %92 = vmatpush.msra.mxu1 %v67_v6  ;;  %v179_v7 = vld [vmem:[%s311_s2] ss:$0 sm:$0xff] }
   0x9   :  { %174 = vmatmul.msk.f32.vlgmr.msra.gmra.mxu0 %vm42_vm0, %v33_v4  ;;  %v98_v11 = vld [vmem:[%s314_s5] sm:$0xff] }
   0xa   :  { %122 = vmatpush.msra.mxu2 %v98_v11  ;;  %v180_v12 = vld [vmem:[%s313_s4] ss:$0 sm:$0xff] }
   0xb   :  { %v128_v17 = vld [vmem:[%s316_s7] sm:$0xff]  ;;  %s165_s7 = sshll.u32 %s318_s9, 4  ;;  %s166_s7 = int_to_ptr.hbm [resolvable:$true] %s165_s7 }
   0xc   :  { %152 = vmatpush.msra.mxu3 %v128_v17  ;;  %v181_v18 = vld [vmem:[%s315_s6] ss:$0 sm:$0xff] }
   0xd   :  { %v182_v22 = vld [vmem:[%s317_s8] ss:$0 sm:$0xff] }
  0x86   :  { %v63_v8 = vpop.f32.mrf.mxu0 }
  0x87   :  { %v64_v9 = vadd.f32 %v179_v7, %v63_v8 }
  0x89   :  { %v66_v10 = vmax.f32 %v64_v9, 0.0 }
  0x8b   :  { %175 = vmatmul.msk.f32.vlgmr.msra.gmra.mxu1 %vm73_vm1, %v66_v10 }
 0x108   :  { %v94_v13 = vpop.f32.mrf.mxu1 }
 0x109   :  { %v95_v14 = vadd.f32 %v180_v12, %v94_v13 }
 0x10b   :  { %v97_v15 = vmax.f32 %v95_v14, 0.0 }
 0x10d   :  { %176 = vmatmul.msk.f32.vlgmr.msra.gmra.mxu2 %vm103_vm2, %v97_v15 }
 0x190   :  { %v124_v19 = vpop.f32.mrf.mxu2 }
 0x191   :  { %v125_v20 = vadd.f32 %v181_v18, %v124_v19 }
 0x193   :  { %v127_v21 = vmax.f32 %v125_v20, 0.0 }
 0x195   :  { %177 = vmatmul.msk.f32.vlgmr.msra.gmra.mxu3 %vm73_vm1, %v127_v21 }
 0x218   :  { %v154_v23 = vpop.f32.mrf.mxu3 }
 0x219   :  { %v155_v24 = vadd.f32 %v182_v22, %v154_v23 }
 0x21b   :  { %157 = vst.msk [vmem:[#allocation2] sm:$0xff] %vm42_vm0, %v155_v24 }
 0x21c   :  { %168 = dma.vmem_to_hbm [thread:$0]  %s164_s11, 128, %s166_s7, [#allocation3]  }
 0x21d   :  { %207 = dma.done.wait [#allocation3], 128  }
 0x21e   :  { %208 = vsyncadd [#allocation3], 4294967168 }
 0x21f   :  { %173 = vsyncpa [#allocation3], 1 }

</bundles_post_ra>
